<compile_context>
chip_gen: v6e
topology: v6e:2x2x1
jax: 0.10.0
libtpu: 0.0.40
codegen_flags: <defaults>
</compile_context>

<pallas_src>
import numpy as np
import jax
import jax.numpy as jnp
from jax.experimental import pallas as pl
from jax.experimental.pallas import tpu as pltpu

# ----- small config consistent with the module -----
B, S = 2, 8            # batch, seq
DIM = 128              # rotary dim (module default: dim=128)
BASE = 10000.0         # rope base
NSTREAM = 3            # mrope position streams: temporal / height / width


# ----------------------------- Pallas kernel --------------------------------
def rope_cos_sin_kernel(pos_ref, inv_ref, cos_ref, sin_ref):
    """One row-tile per grid step: builds the (TR, DIM) cos/sin tables."""
    # int32 positions cast in-kernel (cheap VPU op on a (TR, 1) column).
    pos = pos_ref[...].astype(jnp.float32)          # (TR, 1)
    # Outer product against the pre-duplicated inv_freq row.  This IS
    # emb = cat(freqs, freqs) of the reference: inv_ref already holds
    # [inv_freq | inv_freq] across the 128 lanes, so no in-kernel concat.
    emb = pos * inv_ref[...]                        # (TR, DIM), lane-dense
    cos_ref[...] = jnp.cos(emb).astype(cos_ref.dtype)
    sin_ref[...] = jnp.sin(emb).astype(sin_ref.dtype)


# ------------------------------- wrapper -------------------------------------
def qwen2vl_rotary_embedding(x, position_ids, inv_freq):
    """position_ids: (3, B, S) int32 -> (cos, sin), each (3, B, S, DIM) in x.dtype."""
    t, b, s = position_ids.shape
    dim = 2 * inv_freq.shape[0]
    rows = t * b * s

    # Wrapper-side layout plumbing (not compute):
    #  - fold streams * batch * seq onto the sublane axis (one flat row axis),
    #  - duplicate inv_freq so the kernel needs no lane concatenate,
    #  - positions stay int32 (cast happens in-kernel).
    pos = position_ids.reshape(rows, 1)                              # (rows, 1) int32
    inv_full = jnp.concatenate([inv_freq, inv_freq])[None, :]        # (1, dim) f32

    # Row tiling: one block for small shapes, 1024-row tiles at production
    # sequence lengths (pure HBM-write-streaming regime).
    if rows >= 1024:
        tr = 1024
    else:
        tr = ((rows + 15) // 16) * 16          # round up for sublane packing
    rows_padded = ((rows + tr - 1) // tr) * tr
    if rows_padded != rows:
        # Padded rows compute cos(0)=1 / sin(0)=0 and are sliced off below.
        pos = jnp.pad(pos, ((0, rows_padded - rows), (0, 0)))
    n_blocks = rows_padded // tr

    out_sds = jax.ShapeDtypeStruct((rows_padded, dim), x.dtype)
    cos, sin = pl.pallas_call(
        rope_cos_sin_kernel,
        out_shape=(out_sds, out_sds),
        grid_spec=pl.GridSpec(
            grid=(n_blocks,),
            in_specs=[
                pl.BlockSpec((tr, 1), lambda i: (i, 0)),     # positions (int32)
                pl.BlockSpec((1, dim), lambda i: (0, 0)),    # duplicated inv_freq
            ],
            out_specs=(
                pl.BlockSpec((tr, dim), lambda i: (i, 0)),   # cos
                pl.BlockSpec((tr, dim), lambda i: (i, 0)),   # sin
            ),
        ),
        # Row-tile axis is fully independent: single step at toy shapes
        # (no-op), shardable across the two v7x TensorCores at production S.
        compiler_params=pltpu.CompilerParams(
            dimension_semantics=("parallel",)),
    )(pos, inv_full)

    cos = cos[:rows].reshape(t, b, s, dim)
    sin = sin[:rows].reshape(t, b, s, dim)
    return cos, sin


# --------------------------- pure-JAX reference -------------------------------
def reference(x, position_ids, inv_freq):
    """Direct transcription of the torch forward."""
    pos = position_ids.astype(jnp.float32)                            # (3,B,S)
    freqs = pos[..., None] * inv_freq[None, None, None, :]            # (3,B,S,dim/2)
    emb = jnp.concatenate([freqs, freqs], axis=-1)                    # (3,B,S,dim)
    return jnp.cos(emb).astype(x.dtype), jnp.sin(emb).astype(x.dtype)


# ---------------------------------- main --------------------------------------
if __name__ == "__main__":
    key = jax.random.PRNGKey(0)
    kx, kp = jax.random.split(key)

    # x is consulted only for its dtype (and device), exactly as in the torch
    # forward.
    x = jax.random.normal(kx, (B, S, DIM), jnp.float32)
    position_ids = jax.random.randint(kp, (NSTREAM, B, S), 0, 32, jnp.int32)

    # Registered buffer of the module (built in __init__, not in forward).
    inv_freq = 1.0 / (BASE ** (jnp.arange(0, DIM, 2, dtype=jnp.float32) / DIM))

    cos, sin = qwen2vl_rotary_embedding(x, position_ids, inv_freq)
    cos, sin = jax.block_until_ready((cos, sin))

    cos_ref, sin_ref = reference(x, position_ids, inv_freq)
    np.testing.assert_allclose(np.asarray(cos), np.asarray(cos_ref),
                               rtol=1e-4, atol=1e-4)
    np.testing.assert_allclose(np.asarray(sin), np.asarray(sin_ref),
                               rtol=1e-4, atol=1e-4)
    print("KERNEL_OK")
</pallas_src>

<mosaic_0001>
module attributes {stable_mosaic.version = 11 : i64} {
  func.func @rope_cos_sin_kernel(%arg0: i32, %arg1: memref<48x1xi32, #tpu.memory_space<vmem>>, %arg2: memref<1x128xf32, #tpu.memory_space<vmem>>, %arg3: memref<48x128xf32, #tpu.memory_space<vmem>>, %arg4: memref<48x128xf32, #tpu.memory_space<vmem>>) attributes {dimension_semantics = [#tpu.dimension_semantics<parallel>], iteration_bounds = array<i64: 1>, scalar_prefetch = 0 : i64, scratch_operands = 0 : i64, tpu.core_type = #tpu.core_type<tc>, window_params = [{transform_indices = @transform_0, window_bounds = array<i64: 48, 1>}, {pipeline_mode = #tpu.pipeline_mode<synchronous>, transform_indices = @transform_1, window_bounds = array<i64: 1, 128>}, {transform_indices = @transform_2, window_bounds = array<i64: 48, 128>}, {transform_indices = @transform_3, window_bounds = array<i64: 48, 128>}]} {
    %c0 = arith.constant 0 : index
    %c0_0 = arith.constant 0 : index
    %0 = vector.load %arg1[%c0, %c0_0] : memref<48x1xi32, #tpu.memory_space<vmem>>, vector<48x1xi32>
    %1 = arith.sitofp %0 : vector<48x1xi32> to vector<48x1xf32>
    %c0_1 = arith.constant 0 : index
    %c0_2 = arith.constant 0 : index
    %2 = vector.load %arg2[%c0_1, %c0_2] : memref<1x128xf32, #tpu.memory_space<vmem>>, vector<1x128xf32>
    %3 = vector.broadcast %1 : vector<48x1xf32> to vector<48x128xf32>
    %4 = vector.broadcast %2 : vector<1x128xf32> to vector<48x128xf32>
    %5 = arith.mulf %3, %4 : vector<48x128xf32>
    %6 = math.cos %5 : vector<48x128xf32>
    %c0_3 = arith.constant 0 : index
    %c0_4 = arith.constant 0 : index
    %7 = vector.load %arg3[%c0_3, %c0_4] : memref<48x128xf32, #tpu.memory_space<vmem>>, vector<48x128xf32>
    tpu.vector_store %arg3[%c0_3, %c0_4], %6 {strides = array<i32>} : memref<48x128xf32, #tpu.memory_space<vmem>>, vector<48x128xf32>,
    %8 = math.sin %5 : vector<48x128xf32>
    %c0_5 = arith.constant 0 : index
    %c0_6 = arith.constant 0 : index
    %9 = vector.load %arg4[%c0_5, %c0_6] : memref<48x128xf32, #tpu.memory_space<vmem>>, vector<48x128xf32>
    tpu.vector_store %arg4[%c0_5, %c0_6], %8 {strides = array<i32>} : memref<48x128xf32, #tpu.memory_space<vmem>>, vector<48x128xf32>,
    return
  }
  func.func @transform_0(%arg0: i32) -> (i32, i32) {
    %c0_i32 = arith.constant 0 : i32
    %c0_i32_0 = arith.constant 0 : i32
    return %arg0, %c0_i32 : i32, i32
  }
  func.func @transform_1(%arg0: i32) -> (i32, i32) {
    %c0_i32 = arith.constant 0 : i32
    %c0_i32_0 = arith.constant 0 : i32
    %c0_i32_1 = arith.constant 0 : i32
    return %c0_i32, %c0_i32_0 : i32, i32
  }
  func.func @transform_2(%arg0: i32) -> (i32, i32) {
    %c0_i32 = arith.constant 0 : i32
    %c0_i32_0 = arith.constant 0 : i32
    return %arg0, %c0_i32 : i32, i32
  }
  func.func @transform_3(%arg0: i32) -> (i32, i32) {
    %c0_i32 = arith.constant 0 : i32
    %c0_i32_0 = arith.constant 0 : i32
    return %arg0, %c0_i32 : i32, i32
  }
}

</mosaic_0001>

<bundles_post_ra>
// kernel: tpu_custom_call.1
= control target key start
LH: loop header
LB: loop body
LE: loop exit
PB: predicated region body
PF: predicated region fallthrough
CT: control target
= control target key end

     0   :  { %9 = vsyncpa [#allocation3], 0  ;;  %v1510_v3 = vmov 0   ;;  %s2086_s0 = inlined_call_operand.vmem [shape: s32[48,1], index: 0, kind: input, shape index: {}]   ;;  %s2087_s1 = inlined_call_operand.vmem [shape: f32[1,128], index: 1, kind: input, shape index: {}]   ;;  %s2088_s2 = inlined_call_operand.hbm [shape: f32[48,128], index: 2, kind: output, shape index: {0}]   ;;  %s2089_s3 = inlined_call_operand.hbm [shape: f32[48,128], index: 3, kind: output, shape index: {1}]  }
   0x1   :  { %v17_v0 = vld [vmem:[%s2086_s0 + $0x10] sm:$0xff]  ;;  %v15_v1 = vld [vmem:[%s2086_s0] sm:$0xff]  ;;  %v18_v2 = vld [vmem:[%s2086_s0 + $0x18] sm:$0xff]  ;;  %1441 = vset.pattern.permute.xlu1 %v1510_v3  ;;  %1440 = vset.pattern.permute.xlu0 %v1510_v3 }
   0x2   :  { %v23_v4 = vcvt.s32.f32 %v17_v0  ;;  %v21_v5 = vcvt.s32.f32 %v15_v1  ;;  %v16_v6 = vld [vmem:[%s2086_s0 + $0x8] sm:$0xff] }
   0x3   :  { %10 = vsyncpa [#allocation5], 0  ;;  %v24_v7 = vcvt.s32.f32 %v18_v2  ;;  %v22_v8 = vcvt.s32.f32 %v16_v6  ;;  %v20_v9 = vld [vmem:[%s2086_s0 + $0x28] sm:$0xff]  ;;  %v19_v10 = vld [vmem:[%s2086_s0 + $0x20] sm:$0xff]  ;;  %v1511_v46 = vmov 683565275  }
   0x4   :  { %40 = vperm.xlu1 %1441, %v23_v4   ;;  %30 = vperm.xlu0 %1440, %v21_v5   ;;  %v26_v11 = vcvt.s32.f32 %v20_v9  ;;  %v25_v12 = vcvt.s32.f32 %v19_v10  ;;  %v1562_v13 = vld [vmem:[%s2087_s1] ss:$0 sm:$0xff]  ;;  %v1512_v50 = vmov 2475754826   ;;  %v1513_v52 = vmov 2131351028  }
   0x5   :  { %v1514_v54 = vmov 2102212464   ;;  %v1515_v56 = vmov 920167782   ;;  %v1516_v63 = vmov 1326507024  }
   0x6   :  { %s1517_s0 = smov [#allocation2]   ;;  %s1518_s26 = smov [#allocation4]  }
   0x7   :  { %s1329_s1 = sshll.u32 %s1517_s0, 4  ;;  %s1341_s27 = sshll.u32 %s1518_s26, 4  ;;  %s1330_s1 = int_to_ptr.vmem [resolvable:$true] %s1329_s1  ;;  %s1342_s27 = int_to_ptr.vmem [resolvable:$true] %s1341_s27 }
   0x8   :  { %45 = vperm.xlu1 %1441, %v24_v7   ;;  %35 = vperm.xlu0 %1440, %v22_v8   ;;  %s1466_s28 = scalar_lea.vmem %s1330_s1, 768  ;;  %p1471_p1 = scmp.lt.s32.totalorder %s1330_s1, %s1330_s1 }
   0x9   :  { %p1467_p0 = scmp.ne.s32.totalorder %s1330_s1, %s1466_s28  ;;  %p1472_p2 = scmp.lt.s32.totalorder %s1466_s28, %s1466_s28 }
   0xb   :  { %p1473_p3 = por %p1472_p2, %p1471_p1 }
   0xc   :  { %55 = vperm.xlu1 %1441, %v26_v11   ;;  %50 = vperm.xlu0 %1440, %v25_v12  }
   0xd   :  { %p1474_p4 = pnand %p1473_p3, %p1467_p0 }
  0x7f   :  { %v41_v14 = vpop.permute.xlu1 %40  ;;  %v31_v15 = vpop.permute.xlu0 %30 }
  0x80   :  { %v1565_v16 = vmul.f32 %v1562_v13, %v41_v14  ;;  %v1568_v17 = vmul.f32 %v1562_v13, %v31_v15 }
  0x82   :  { %v276_v18 = vand.u32 2147483647, %v1565_v16  ;;  %v279_v19 = vand.u32 2139095040, %v1565_v16  ;;  %v70_v20 = vand.u32 2147483647, %v1568_v17  ;;  %v73_v21 = vand.u32 2139095040, %v1568_v17 }
  0x83   :  { %v46_v22 = vpop.permute.xlu1 %45  ;;  %vm278_vm14 = vcmp.lt.s32.totalorder %v1565_v16, 0 }
  0x84   :  { %v280_v23 = vshrl.u32 %v279_v19, 23  ;;  %v1575_v24 = vmul.f32 %v1562_v13, %v46_v22  ;;  %v283_v25 = vand.u32 8388607, %v276_v18  ;;  %v74_v26 = vshrl.u32 %v73_v21, 23 }
  0x85   :  { %v77_v27 = vand.u32 8388607, %v70_v20  ;;  %vm1665_vm13 = vcmp.le.f32.partialorder %v276_v18, 0.7853982 }
  0x86   :  { %v1365_v28 = vadd.s32 4294967169, %v280_v23  ;;  %v1357_v29 = vadd.s32 4294967169, %v74_v26  ;;  %v382_v30 = vand.u32 2139095040, %v1575_v24  ;;  %v284_v32 = vor.u32 8388608, %v283_v25 }
  0x87   :  { %v78_v33 = vor.u32 8388608, %v77_v27  ;;  %v379_v44 = vand.u32 2147483647, %v1575_v24 }
  0x88   :  { %v286_v31 = vadd.s32 1, %v1365_v28  ;;  %v80_v34 = vadd.s32 1, %v1357_v29  ;;  %v383_v35 = vshrl.u32 %v382_v30, 23  ;;  %v1582_v41 = vshll.u32 %v284_v32, 8 }
  0x89   :  { %v1586_v43 = vshll.u32 %v78_v33, 8 }
  0x8a   :  { %vm287_vm0 = vcmp.gt.s32.totalorder %v286_v31, 0  ;;  %vm81_vm1 = vcmp.gt.s32.totalorder %v80_v34, 0  ;;  %v1369_v37 = vadd.s32 4294967169, %v383_v35 }
  0x8b   :  { %v288_v36 = vsel %vm287_vm0, %v286_v31, 0  ;;  %v82_v40 = vsel %vm81_vm1, %v80_v34, 0 }
  0x8c   :  { %v289_v38 = vshrl.u32 %v288_v36, 5  ;;  %v290_v39 = vand.u32 31, %v288_v36  ;;  %v1584_v42 = vshrl.u32 %v82_v40, 5  ;;  %v84_v48 = vand.u32 31, %v82_v40 }
  0x8d   :  { %v1590_v49 = vadd.s32 1, %v1369_v37 }
  0x8e   :  { %v291_v45 = vsub.s32 32, %v290_v39  ;;  %v293_v47 = vshll.u32 %v1511_v46, %v290_v39  ;;  %v296_v51 = vshll.u32 %v1512_v50, %v290_v39  ;;  %v299_v53 = vshll.u32 %v1513_v52, %v290_v39 }
  0x8f   :  { %v302_v55 = vshll.u32 %v1514_v54, %v290_v39  ;;  %v305_v57 = vshll.u32 %v1515_v56, %v290_v39  ;;  %vm308_vm2 = vcmp.lt.s32.totalorder %v289_v38, 1  ;;  %vm309_vm3 = vcmp.lt.s32.totalorder %v289_v38, 2 }
  0x90   :  { %v294_v58 = vshrl.u32 %v1512_v50, %v291_v45  ;;  %v297_v59 = vshrl.u32 %v1513_v52, %v291_v45  ;;  %v300_v60 = vshrl.u32 %v1514_v54, %v291_v45  ;;  %v292_v61 = vshrl.u32 %v1511_v46, %v291_v45 }
  0x91   :  { %v303_v62 = vshrl.u32 %v1515_v56, %v291_v45  ;;  %v306_v0 = vshrl.u32 %v1516_v63, %v291_v45  ;;  %v85_v4 = vsub.s32 32, %v84_v48  ;;  %vm310_vm4 = vcmp.lt.s32.totalorder %v289_v38, 3 }
  0x92   :  { %v295_v1 = vor.u32 %v294_v58, %v293_v47  ;;  %v298_v2 = vor.u32 %v297_v59, %v296_v51  ;;  %v301_v3 = vor.u32 %v300_v60, %v299_v53  ;;  %vm311_vm5 = vcmp.lt.s32.totalorder %v289_v38, 4 }
  0x93   :  { %v304_v5 = vor.u32 %v303_v62, %v302_v55  ;;  %v307_v6 = vor.u32 %v306_v0, %v305_v57  ;;  %v87_v15 = vshll.u32 %v1511_v46, %v84_v48  ;;  %v88_v22 = vshrl.u32 %v1512_v50, %v85_v4 }
  0x94   :  { %v312_v7 = vsel %vm308_vm2, %v292_v61, %v295_v1  ;;  %v313_v8 = vsel %vm311_vm5, %v301_v3, 2102212464  ;;  %v316_v9 = vsel %vm308_vm2, %v295_v1, %v298_v2  ;;  %v320_v10 = vsel %vm308_vm2, %v298_v2, %v301_v3 }
  0x95   :  { %v314_v11 = vsel %vm310_vm4, %v298_v2, %v313_v8  ;;  %v317_v12 = vsel %vm311_vm5, %v304_v5, 920167782  ;;  %v321_v14 = vsel %vm311_vm5, %v307_v6, 1326507024  ;;  %v90_v23 = vshll.u32 %v1512_v50, %v84_v48  ;;  %v36_v2 = vpop.permute.xlu0 %35 }
  0x96   :  { %v318_v19 = vsel %vm310_vm4, %v301_v3, %v317_v12  ;;  %v322_v21 = vsel %vm310_vm4, %v304_v5, %v321_v14  ;;  %v315_v25 = vsel %vm309_vm3, %v312_v7, %v314_v11  ;;  %v91_v28 = vshrl.u32 %v1513_v52, %v85_v4 }
  0x97   :  { %v319_v26 = vsel %vm309_vm3, %v316_v9, %v318_v19  ;;  %v323_v27 = vsel %vm309_vm3, %v320_v10, %v322_v21  ;;  %v89_v33 = vor.u32 %v88_v22, %v87_v15  ;;  %v93_v35 = vshll.u32 %v1513_v52, %v84_v48 }
  0x98   :  { %v1613_v29 = vmul.u32.u64.low %v1582_v41, %v323_v27  ;;  %v1614_v30 = vmul.u32.u64.high %v1582_v41, %v323_v27, %v1613_v29  ;;  %v1617_v31 = vmul.u32.u64.low %v1582_v41, %v319_v26  ;;  %v1618_v32 = vmul.u32.u64.high %v1582_v41, %v319_v26, %v1617_v31 }
  0x99   :  { %v92_v34 = vor.u32 %v91_v28, %v90_v23  ;;  %v94_v36 = vshrl.u32 %v1514_v54, %v85_v4  ;;  %v86_v37 = vshrl.u32 %v1511_v46, %v85_v4  ;;  %v96_v38 = vshll.u32 %v1514_v54, %v84_v48 }
  0x9a   :  { %v97_v39 = vshrl.u32 %v1515_v56, %v85_v4  ;;  %v100_v40 = vshrl.u32 %v1516_v63, %v85_v4  ;;  %v331_v45 = vmul.u32 %v1582_v41, %v315_v25  ;;  %v99_v51 = vshll.u32 %v1515_v56, %v84_v48 }
  0x9b   :  { %v95_v47 = vor.u32 %v94_v36, %v93_v35  ;;  %vm102_vm6 = vcmp.lt.s32.totalorder %v1584_v42, 1  ;;  %vm333_vm7 = vc.u32 %v1614_v30, %v1617_v31  ;;  %v334_v53 = vadd.s32 1, %v1618_v32 }
  0x9c   :  { %v98_v55 = vor.u32 %v97_v39, %v96_v38  ;;  %vm103_vm8 = vcmp.lt.s32.totalorder %v1584_v42, 2  ;;  %v101_v57 = vor.u32 %v100_v40, %v99_v51  ;;  %vm104_vm9 = vcmp.lt.s32.totalorder %v1584_v42, 3 }
  0x9d   :  { %vm105_vm10 = vcmp.lt.s32.totalorder %v1584_v42, 4  ;;  %v110_v58 = vsel %vm102_vm6, %v89_v33, %v92_v34  ;;  %v335_v41 = vsel %vm333_vm7, %v334_v53, %v1618_v32  ;;  %v114_v60 = vsel %vm102_vm6, %v92_v34, %v95_v47 }
  0x9e   :  { %v107_v59 = vsel %vm105_vm10, %v95_v47, 2102212464  ;;  %v111_v48 = vsel %vm105_vm10, %v98_v55, 920167782  ;;  %v336_v61 = vadd.s32 %v335_v41, %v331_v45  ;;  %v106_v62 = vsel %vm102_vm6, %v86_v37, %v89_v33 }
  0x9f   :  { %v112_v0 = vsel %vm104_vm9, %v95_v47, %v111_v48  ;;  %v115_v1 = vsel %vm105_vm10, %v101_v57, 1326507024  ;;  %v108_v3 = vsel %vm104_vm9, %v92_v34, %v107_v59  ;;  %vm390_vm11 = vcmp.gt.s32.totalorder %v1590_v49, 0 }
  0xa0   :  { %v113_v4 = vsel %vm103_vm8, %v110_v58, %v112_v0  ;;  %v116_v5 = vsel %vm104_vm9, %v98_v55, %v115_v1  ;;  %v337_v6 = vadd.s32 536870912, %v336_v61  ;;  %v1651_v12 = vmul.f32 %v1562_v13, %v36_v2 }
  0xa1   :  { %v117_v7 = vsel %vm103_vm8, %v114_v60, %v116_v5  ;;  %v1643_v8 = vmul.u32.u64.low %v1586_v43, %v113_v4  ;;  %v1644_v9 = vmul.u32.u64.high %v1586_v43, %v113_v4, %v1643_v8  ;;  %v109_v15 = vsel %vm103_vm8, %v106_v62, %v108_v3 }
  0xa2   :  { %v1647_v10 = vmul.u32.u64.low %v1586_v43, %v117_v7  ;;  %v1648_v11 = vmul.u32.u64.high %v1586_v43, %v117_v7, %v1647_v10  ;;  %v338_v14 = vshrl.u32 %v337_v6, 30  ;;  %v391_v19 = vsel %vm390_vm11, %v1590_v49, 0 }
  0xa3   :  { %v128_v22 = vadd.s32 1, %v1644_v9  ;;  %v386_v23 = vand.u32 8388607, %v379_v44  ;;  %v125_v25 = vmul.u32 %v1586_v43, %v109_v15  ;;  %v176_v26 = vand.u32 2139095040, %v1651_v12 }
  0xa4   :  { %v339_v21 = vshll.u32 %v338_v14, 30  ;;  %vm127_vm12 = vc.u32 %v1648_v11, %v1643_v8  ;;  %v393_v29 = vand.u32 31, %v391_v19  ;;  %v362_v36 = vsub.s32 4, %v338_v14 }
  0xa5   :  { %v129_v28 = vsel %vm127_vm12, %v128_v22, %v1644_v9  ;;  %v387_v33 = vor.u32 8388608, %v386_v23  ;;  %v177_v34 = vshrl.u32 %v176_v26, 23  ;;  %v173_v39 = vand.u32 2147483647, %v1651_v12 }
  0xa6   :  { %v340_v27 = vsub.s32 %v336_v61, %v339_v21  ;;  %v130_v42 = vadd.s32 %v129_v28, %v125_v25  ;;  %v394_v37 = vsub.s32 32, %v393_v29  ;;  %v332_v40 = vadd.s32 %v1617_v31, %v1614_v30 }
  0xa7   :  { %v1675_v47 = vshrl.u32 %v391_v19, 5  ;;  %v1677_v51 = vshll.u32 %v387_v33, 8  ;;  %v1680_v53 = vadd.s32 %v1643_v8, %v1648_v11  ;;  %v396_v55 = vshll.u32 %v1511_v46, %v393_v29 }
  0xa8   :  { %v342_v32 = vsub.s32 0, %v340_v27  ;;  %v131_v49 = vadd.s32 536870912, %v130_v42  ;;  %v1361_v57 = vadd.s32 4294967169, %v177_v34  ;;  %v363_v41 = vsel %vm278_vm14, %v362_v36, %v338_v14 }
  0xa9   :  { %v399_v59 = vshll.u32 %v1512_v50, %v393_v29  ;;  %v406_v30 = vshrl.u32 %v1515_v56, %v394_v37  ;;  %v397_v48 = vshrl.u32 %v1512_v50, %v394_v37  ;;  %v400_v60 = vshrl.u32 %v1513_v52, %v394_v37 }
  0xaa   :  { %v1366_v35 = vmin.u32 %v342_v32, %v340_v27  ;;  %v1670_v38 = vshrl.u32 %v131_v49, 30  ;;  %v403_v61 = vshrl.u32 %v1514_v54, %v394_v37  ;;  %v395_v62 = vshrl.u32 %v1511_v46, %v394_v37 }
  0xab   :  { %v405_v0 = vshll.u32 %v1514_v54, %v393_v29  ;;  %v409_v1 = vshrl.u32 %v1516_v63, %v394_v37  ;;  %v1698_v3 = vsel %vm1665_vm13, 0, %v363_v41  ;;  %v402_v5 = vshll.u32 %v1513_v52, %v393_v29 }
  0xac   :  { %v344_v45 = vclz %v1366_v35  ;;  %v133_v18 = vshll.u32 %v1670_v38, 30  ;;  %v408_v9 = vshll.u32 %v1515_v56, %v393_v29  ;;  %v398_v11 = vor.u32 %v397_v48, %v396_v55 }
  0xad   :  { %v407_v8 = vor.u32 %v406_v30, %v405_v0  ;;  %v401_v14 = vor.u32 %v400_v60, %v399_v59  ;;  %v404_v15 = vor.u32 %v403_v61, %v402_v5  ;;  %v156_v26 = vsub.s32 4, %v1670_v38 }
  0xae   :  { %v1367_v58 = vadd.s32 4294967294, %v344_v45  ;;  %v1688_v31 = vsub.s32 %v130_v42, %v133_v18  ;;  %v410_v23 = vor.u32 %v409_v1, %v408_v9  ;;  %vm411_vm0 = vcmp.lt.s32.totalorder %v1675_v47, 1 }
  0xaf   :  { %vm414_vm1 = vcmp.lt.s32.totalorder %v1675_v47, 4  ;;  %vm412_vm2 = vcmp.lt.s32.totalorder %v1675_v47, 2  ;;  %vm413_vm3 = vcmp.lt.s32.totalorder %v1675_v47, 3  ;;  %v423_v33 = vsel %vm411_vm0, %v401_v14, %v404_v15 }
  0xb0   :  { %vm1368_vm15 = vcmp.lt.s32.totalorder %v1367_v58, 0  ;;  %v136_v4 = vsub.s32 0, %v1688_v31  ;;  %v420_v29 = vsel %vm414_vm1, %v407_v8, 920167782  ;;  %vm72_vm4 = vcmp.lt.s32.totalorder %v1568_v17, 0 }
  0xb1   :  { %v347_v2 = vsel %vm1368_vm15, 0, %v1367_v58  ;;  %v416_v34 = vsel %vm414_vm1, %v404_v15, 2102212464  ;;  %v421_v35 = vsel %vm413_vm3, %v404_v15, %v420_v29  ;;  %v424_v36 = vsel %vm414_vm1, %v410_v23, 1326507024 }
  0xb2   :  { %v348_v6 = vsub.s32 32, %v347_v2  ;;  %v352_v7 = vsub.s32 4294967266, %v347_v2  ;;  %v1358_v10 = vmin.u32 %v136_v4, %v1688_v31  ;;  %v349_v19 = vshll.u32 %v340_v27, %v347_v2 }
  0xb3   :  { %v419_v27 = vsel %vm411_vm0, %v398_v11, %v401_v14  ;;  %v425_v45 = vsel %vm413_vm3, %v407_v8, %v424_v36  ;;  %vm1726_vm6 = vcmp.le.f32.partialorder %v70_v20, 0.7853982  ;;  %v417_v60 = vsel %vm413_vm3, %v401_v14, %v416_v34 }
  0xb4   :  { %v350_v21 = vshrl.u32 %v332_v40, %v348_v6  ;;  %v353_v22 = vadd.s32 127, %v352_v7  ;;  %v138_v25 = vclz %v1358_v10  ;;  %v415_v40 = vsel %vm411_vm0, %v395_v62, %v398_v11  ;;  %v56_v7 = vpop.permute.xlu1 %55 }
  0xb5   :  { %v422_v58 = vsel %vm412_vm2, %v419_v27, %v421_v35  ;;  %v426_v41 = vsel %vm412_vm2, %v423_v33, %v425_v45  ;;  %v183_v61 = vadd.s32 1, %v1361_v57  ;;  %v995_v9 = vadd.s32 3, %v1698_v3 }
  0xb6   :  { %v351_v28 = vor.u32 %v350_v21, %v349_v19  ;;  %v354_v42 = vshll.u32 %v353_v22, 23  ;;  %v1359_v32 = vadd.s32 4294967294, %v138_v25  ;;  %v1746_v57 = vand.u32 8388607, %v173_v39 }
  0xb7   :  { %v1734_v1 = vmul.u32.u64.low %v1677_v51, %v426_v41  ;;  %v1735_v2 = vmul.u32.u64.high %v1677_v51, %v426_v41, %v1734_v1  ;;  %v1739_v20 = vmul.u32.u64.low %v1677_v51, %v422_v58  ;;  %v1740_v6 = vmul.u32.u64.high %v1677_v51, %v422_v58, %v1739_v20 }
  0xb8   :  { %v355_v49 = vor.u32 4788187, %v354_v42  ;;  %v358_v37 = vcvt.s32.f32 %v351_v28  ;;  %vm1360_vm5 = vcmp.lt.s32.totalorder %v1359_v32, 0  ;;  %vm184_vm7 = vcmp.gt.s32.totalorder %v183_v61, 0 }
  0xb9   :  { %v141_v55 = vsel %vm1360_vm5, 0, %v1359_v32  ;;  %v185_v11 = vsel %vm184_vm7, %v183_v61, 0  ;;  %v1753_v15 = vand.u32 3, %v1698_v3  ;;  %vm436_vm8 = vc.u32 %v1735_v2, %v1739_v20 }
  0xba   :  { %v356_v18 = vand.u32 2147483647, %v355_v49  ;;  %v142_v30 = vsub.s32 32, %v141_v55  ;;  %v146_v48 = vsub.s32 4294967266, %v141_v55  ;;  %v143_v0 = vshll.u32 %v1688_v31, %v141_v55 }
  0xbb   :  { %v1758_v19 = vmul.f32 %v1562_v13, %v56_v7  ;;  %v157_v47 = vsel %vm72_vm4, %v156_v26, %v1670_v38  ;;  %v437_v23 = vadd.s32 1, %v1740_v6  ;;  %v1767_v3 = vand.u32 3, %v995_v9 }
  0xbc   :  { %v359_v62 = vmul.f32 %v358_v37, %v356_v18  ;;  %v144_v4 = vshrl.u32 %v1680_v53, %v142_v30  ;;  %v147_v5 = vadd.s32 127, %v146_v48  ;;  %v418_v53 = vsel %vm412_vm2, %v415_v40, %v417_v60 }
  0xbd   :  { %v434_v25 = vmul.u32 %v1677_v51, %v418_v53  ;;  %v187_v28 = vand.u32 31, %v185_v11  ;;  %v438_v32 = vsel %vm436_vm8, %v437_v23, %v1740_v6  ;;  %v159_v43 = vsel %vm1726_vm6, 0, %v157_v47 }
  0xbe   :  { %v360_v8 = vxor.u32 2147483648, %v359_v62  ;;  %v145_v31 = vor.u32 %v144_v4, %v143_v0  ;;  %v148_v10 = vshll.u32 %v147_v5, 23  ;;  %v1773_v33 = vshrl.u32 %v185_v11, 5 }
  0xbf   :  { %v439_v27 = vadd.s32 %v438_v32, %v434_v25  ;;  %v188_v38 = vsub.s32 32, %v187_v28  ;;  %v190_v49 = vshll.u32 %v1511_v46, %v187_v28  ;;  %v193_v34 = vshll.u32 %v1512_v50, %v187_v28 }
  0xc0   :  { %v361_v14 = vsel %vm278_vm14, %v360_v8, %v359_v62  ;;  %v149_v22 = vor.u32 4788187, %v148_v10  ;;  %v152_v29 = vcvt.s32.f32 %v145_v31  ;;  %v196_v51 = vshll.u32 %v1513_v52, %v187_v28 }
  0xc1   :  { %v364_v21 = vsel %vm1665_vm13, %v1565_v16, %v361_v14  ;;  %v440_v35 = vadd.s32 536870912, %v439_v27  ;;  %v191_v36 = vshrl.u32 %v1512_v50, %v188_v38  ;;  %v194_v37 = vshrl.u32 %v1513_v52, %v188_v38 }
  0xc2   :  { %1442 = vcosq.f32 %v364_v21  ;;  %v150_v42 = vand.u32 2147483647, %v149_v22  ;;  %v199_v40 = vshll.u32 %v1514_v54, %v187_v28  ;;  %v197_v18 = vshrl.u32 %v1514_v54, %v188_v38 }
  0xc3   :  { %1444 = vsinq.f32 %v364_v21  ;;  %v200_v55 = vshrl.u32 %v1515_v56, %v188_v38  ;;  %v203_v58 = vshrl.u32 %v1516_v63, %v188_v38  ;;  %v1784_v41 = vshrl.u32 %v440_v35, 30 }
  0xc4   :  { %v153_v26 = vmul.f32 %v152_v29, %v150_v42  ;;  %v181_v30 = vor.u32 8388608, %v1746_v57  ;;  %v192_v48 = vor.u32 %v191_v36, %v190_v49  ;;  %v195_v60 = vor.u32 %v194_v37, %v193_v34 }
  0xc5   :  { %vm374_vm9 = vcmp.eq.s32.totalorder %v1753_v15, 2  ;;  %v198_v62 = vor.u32 %v197_v18, %v196_v51  ;;  %v201_v0 = vor.u32 %v200_v55, %v199_v40  ;;  %v202_v1 = vshll.u32 %v1515_v56, %v187_v28 }
  0xc6   :  { %v154_v45 = vxor.u32 2147483648, %v153_v26  ;;  %vm371_vm10 = vcmp.eq.s32.totalorder %v1753_v15, 0  ;;  %v442_v5 = vshll.u32 %v1784_v41, 30  ;;  %vm205_vm11 = vcmp.lt.s32.totalorder %v1773_v33, 1 }
  0xc7   :  { %vm208_vm12 = vcmp.lt.s32.totalorder %v1773_v33, 4  ;;  %vm370_vm13 = vcmp.lt.s32.totalorder %v1753_v15, 2  ;;  %vm997_vm14 = vcmp.lt.s32.totalorder %v1767_v3, 2  ;;  %v204_v6 = vor.u32 %v203_v58, %v202_v1 }
  0xc8   :  { %v155_v61 = vsel %vm72_vm4, %v154_v45, %v153_v26  ;;  %v213_v7 = vsel %vm205_vm11, %v192_v48, %v195_v60  ;;  %v214_v8 = vsel %vm208_vm12, %v201_v0, 920167782  ;;  %vm368_vm15 = vweird.f32 %v1565_v16 }
  0xc9   :  { %v158_v4 = vsel %vm1726_vm6, %v1568_v17, %v155_v61  ;;  %v787_v59 = vadd.s32 3, %v159_v43  ;;  %v1805_v9 = vsub.s32 %v439_v27, %v442_v5  ;;  %vm207_vm0 = vcmp.lt.s32.totalorder %v1773_v33, 3 }
  0xca   :  { %1446 = vcosq.f32 %v158_v4  ;;  %vm998_vm1 = vcmp.eq.s32.totalorder %v1767_v3, 0  ;;  %vm206_vm2 = vcmp.lt.s32.totalorder %v1773_v33, 2  ;;  %v215_v57 = vsel %vm207_vm0, %v198_v62, %v214_v8 }
  0xcb   :  { %1448 = vsinq.f32 %v158_v4  ;;  %v1812_v31 = vshll.u32 %v181_v30, 8  ;;  %vm1001_vm3 = vcmp.eq.s32.totalorder %v1767_v3, 2  ;;  %v1815_v10 = vand.u32 3, %v159_v43 }
  0xcc   :  { %v445_v53 = vsub.s32 0, %v1805_v9  ;;  %v216_v11 = vsel %vm206_vm2, %v213_v7, %v215_v57  ;;  %v217_v21 = vsel %vm205_vm11, %v195_v60, %v198_v62  ;;  %v218_v22 = vsel %vm208_vm12, %v204_v6, 1326507024 }
  0xcd   :  { %v1825_v47 = vmul.u32.u64.low %v1812_v31, %v216_v11  ;;  %v1826_v23 = vmul.u32.u64.high %v1812_v31, %v216_v11, %v1825_v47  ;;  %v1829_v42 = vand.u32 3, %v787_v59  ;;  %v210_v32 = vsel %vm208_vm12, %v198_v62, 2102212464 }
  0xce   :  { %v1370_v29 = vmin.u32 %v445_v53, %v1805_v9  ;;  %v189_v27 = vshrl.u32 %v1511_v46, %v188_v38  ;;  %v219_v26 = vsel %vm207_vm0, %v201_v0, %v218_v22  ;;  %v588_v49 = vand.u32 2139095040, %v1758_v19 }
  0xcf   :  { %v1443_v14 = vpop.eup %1442  ;;  %vm168_vm4 = vcmp.eq.s32.totalorder %v1815_v10, 2  ;;  %v220_v36 = vsel %vm206_vm2, %v217_v21, %v219_v26  ;;  %vm165_vm5 = vcmp.eq.s32.totalorder %v1815_v10, 0  ;;  %v211_v45 = vsel %vm207_vm0, %v195_v60, %v210_v32 }
  0xd0   :  { %v1445_v25 = vpop.eup %1444  ;;  %v375_v28 = vxor.u32 2147483648, %v1443_v14  ;;  %v447_v35 = vclz %v1370_v29  ;;  %v209_v40 = vsel %vm205_vm11, %v189_v27, %v192_v48  ;;  %vm164_vm6 = vcmp.lt.s32.totalorder %v1815_v10, 2 }
  0xd1   :  { %v372_v43 = vxor.u32 2147483648, %v1445_v25  ;;  %vm789_vm7 = vcmp.lt.s32.totalorder %v1829_v42, 2  ;;  %vm790_vm8 = vcmp.eq.s32.totalorder %v1829_v42, 0  ;;  %v212_v60 = vsel %vm206_vm2, %v209_v40, %v211_v45  ;;  %v51_v40 = vpop.permute.xlu0 %50 }
  0xd2   :  { %v376_v34 = vsel %vm374_vm9, %v375_v28, %v1445_v25  ;;  %v1003_v51 = vsel %vm1001_vm3, %v375_v28, %v1445_v25  ;;  %v1371_v58 = vadd.s32 4294967294, %v447_v35  ;;  %vm162_vm9 = vweird.f32 %v1568_v17 }
  0xd3   :  { %v373_v38 = vsel %vm371_vm10, %v1443_v14, %v372_v43  ;;  %v1000_v37 = vsel %vm998_vm1, %v1443_v14, %v372_v43  ;;  %vm381_vm10 = vcmp.lt.s32.totalorder %v1575_v24, 0  ;;  %v231_v61 = vadd.s32 1, %v1826_v23 }
  0xd4   :  { %v377_v18 = vsel %vm370_vm13, %v373_v38, %v376_v34  ;;  %v1004_v55 = vsel %vm997_vm14, %v1000_v37, %v1003_v51  ;;  %v1868_v15 = vmul.u32.u64.low %v1812_v31, %v220_v36  ;;  %v1869_v3 = vmul.u32.u64.high %v1812_v31, %v220_v36, %v1868_v15 }
  0xd5   :  { %v378_v30 = vsel %vm368_vm15, nan, %v377_v18  ;;  %v1005_v48 = vsel %vm368_vm15, nan, %v1004_v55  ;;  %vm1372_vm11 = vcmp.lt.s32.totalorder %v1371_v58, 0  ;;  %v589_v62 = vshrl.u32 %v588_v49, 23 }
  0xd6   :  { %690 = vst [vmem:[#allocation2 + $0x10] sm:$0xff] %v378_v30  ;;  %1320 = vst [vmem:[#allocation4 + $0x10] sm:$0xff] %v1005_v48  ;;  %vm793_vm12 = vcmp.eq.s32.totalorder %v1829_v42, 2  ;;  %v435_v16 = vadd.s32 %v1739_v20, %v1735_v2  ;;  %v450_v0 = vsel %vm1372_vm11, 0, %v1371_v58  ;;  %v585_v1 = vand.u32 2147483647, %v1758_v19 }
  0xd7   :  { %v1447_v4 = vpop.eup %1446  ;;  %v451_v5 = vsub.s32 32, %v450_v0  ;;  %v455_v6 = vsub.s32 4294967266, %v450_v0  ;;  %v465_v7 = vsub.s32 4, %v1784_v41  ;;  %v1377_v8 = vadd.s32 4294967169, %v589_v62 }
  0xd8   :  { %v1449_v59 = vpop.eup %1448  ;;  %v169_v33 = vxor.u32 2147483648, %v1447_v4  ;;  %v452_v57 = vshll.u32 %v1805_v9, %v450_v0  ;;  %v228_v53 = vmul.u32 %v1812_v31, %v212_v60  ;;  %vm230_vm13 = vc.u32 %v1869_v3, %v1825_v47 }
  0xd9   :  { %v166_v11 = vxor.u32 2147483648, %v1449_v59  ;;  %v453_v2 = vshrl.u32 %v435_v16, %v451_v5  ;;  %v456_v20 = vadd.s32 127, %v455_v6  ;;  %v232_v14 = vsel %vm230_vm13, %v231_v61, %v1826_v23 }
  0xda   :  { %v170_v21 = vsel %vm168_vm4, %v169_v33, %v1449_v59  ;;  %v795_v22 = vsel %vm793_vm12, %v169_v33, %v1449_v59  ;;  %v233_v25 = vadd.s32 %v232_v14, %v228_v53  ;;  %v595_v28 = vadd.s32 1, %v1377_v8 }
  0xdb   :  { %v167_v9 = vsel %vm165_vm5, %v1447_v4, %v166_v11  ;;  %v792_v31 = vsel %vm790_vm8, %v1447_v4, %v166_v11  ;;  %v454_v29 = vor.u32 %v453_v2, %v452_v57  ;;  %v457_v32 = vshll.u32 %v456_v20, 23 }
  0xdc   :  { %v171_v43 = vsel %vm164_vm6, %v167_v9, %v170_v21  ;;  %v796_v23 = vsel %vm789_vm7, %v792_v31, %v795_v22  ;;  %v234_v27 = vadd.s32 536870912, %v233_v25  ;;  %vm596_vm14 = vcmp.gt.s32.totalorder %v595_v28, 0 }
  0xdd   :  { %v172_v26 = vsel %vm162_vm9, nan, %v171_v43  ;;  %v797_v49 = vsel %vm162_vm9, nan, %v796_v23  ;;  %v458_v34 = vor.u32 4788187, %v457_v32  ;;  %v466_v51 = vsel %vm381_vm10, %v465_v7, %v1784_v41 }
  0xde   :  { %688 = vst [vmem:[#allocation2] sm:$0xff] %v172_v26  ;;  %1318 = vst [vmem:[#allocation4] sm:$0xff] %v797_v49  ;;  %vm1905_vm15 = vcmp.le.f32.partialorder %v379_v44, 0.7853982  ;;  %v1909_v42 = vshrl.u32 %v234_v27, 30  ;;  %v597_v35 = vsel %vm596_vm14, %v595_v28, 0  ;;  %v461_v38 = vcvt.s32.f32 %v454_v29 }
  0xdf   :  { %v459_v36 = vand.u32 2147483647, %v458_v34  ;;  %v592_v17 = vand.u32 8388607, %v585_v1  ;;  %v599_v37 = vand.u32 31, %v597_v35  ;;  %v468_v41 = vsel %vm1905_vm15, 0, %v466_v51 }
  0xe0   :  { %v236_v45 = vshll.u32 %v1909_v42, 30  ;;  %v1919_v58 = vmul.f32 %v1562_v13, %v51_v40  ;;  %v1099_v48 = vadd.s32 3, %v468_v41  ;;  %v598_v62 = vshrl.u32 %v597_v35, 5 }
  0xe1   :  { %v462_v18 = vmul.f32 %v461_v38, %v459_v36  ;;  %v600_v44 = vsub.s32 32, %v599_v37  ;;  %v593_v15 = vor.u32 8388608, %v592_v17  ;;  %v602_v16 = vshll.u32 %v1511_v46, %v599_v37 }
  0xe2   :  { %v1916_v55 = vsub.s32 %v233_v25, %v236_v45  ;;  %v605_v5 = vshll.u32 %v1512_v50, %v599_v37  ;;  %v608_v59 = vshll.u32 %v1513_v52, %v599_v37  ;;  %v611_v33 = vshll.u32 %v1514_v54, %v599_v37 }
  0xe3   :  { %v463_v30 = vxor.u32 2147483648, %v462_v18  ;;  %v603_v60 = vshrl.u32 %v1512_v50, %v600_v44  ;;  %v606_v0 = vshrl.u32 %v1513_v52, %v600_v44  ;;  %v609_v13 = vshrl.u32 %v1514_v54, %v600_v44 }
  0xe4   :  { %v239_v61 = vsub.s32 0, %v1916_v55  ;;  %v612_v6 = vshrl.u32 %v1515_v56, %v600_v44  ;;  %v1936_v57 = vand.u32 3, %v468_v41  ;;  %v1938_v21 = vand.u32 3, %v1099_v48 }
  0xe5   :  { %v464_v4 = vsel %vm381_vm10, %v463_v30, %v462_v18  ;;  %v604_v53 = vor.u32 %v603_v60, %v602_v16  ;;  %v607_v11 = vor.u32 %v606_v0, %v605_v5  ;;  %v610_v20 = vor.u32 %v609_v13, %v608_v59 }
  0xe6   :  { %v467_v7 = vsel %vm1905_vm15, %v1575_v24, %v464_v4  ;;  %v1362_v8 = vmin.u32 %v239_v61, %v1916_v55  ;;  %v613_v14 = vor.u32 %v612_v6, %v611_v33  ;;  %v229_v22 = vadd.s32 %v1825_v47, %v1869_v3 }
  0xe7   :  { %1450 = vcosq.f32 %v467_v7  ;;  %v1942_v25 = vshll.u32 %v593_v15, 8  ;;  %v485_v28 = vand.u32 2139095040, %v1919_v58  ;;  %v614_v31 = vshll.u32 %v1515_v56, %v599_v37 }
  0xe8   :  { %1452 = vsinq.f32 %v467_v7  ;;  %v241_v2 = vclz %v1362_v8  ;;  %v615_v29 = vshrl.u32 %v1516_v63, %v600_v44  ;;  %vm617_vm0 = vcmp.lt.s32.totalorder %v598_v62, 1 }
  0xe9   :  { %v601_v32 = vshrl.u32 %v1511_v46, %v600_v44  ;;  %vm619_vm1 = vcmp.lt.s32.totalorder %v598_v62, 3  ;;  %vm620_vm2 = vcmp.lt.s32.totalorder %v598_v62, 4  ;;  %v625_v43 = vsel %vm617_vm0, %v604_v53, %v607_v11 }
  0xea   :  { %v1363_v9 = vadd.s32 4294967294, %v241_v2  ;;  %v616_v23 = vor.u32 %v615_v29, %v614_v31  ;;  %v622_v47 = vsel %vm620_vm2, %v610_v20, 2102212464  ;;  %v626_v3 = vsel %vm620_vm2, %v613_v14, 920167782 }
  0xeb   :  { %v621_v26 = vsel %vm617_vm0, %v601_v32, %v604_v53  ;;  %v623_v49 = vsel %vm619_vm1, %v607_v11, %v622_v47  ;;  %v627_v34 = vsel %vm619_vm1, %v610_v20, %v626_v3  ;;  %vm618_vm4 = vcmp.lt.s32.totalorder %v598_v62, 2 }
  0xec   :  { %vm1364_vm3 = vcmp.lt.s32.totalorder %v1363_v9, 0  ;;  %v629_v35 = vsel %vm617_vm0, %v607_v11, %v610_v20  ;;  %vm474_vm5 = vcmp.eq.s32.totalorder %v1936_v57, 0  ;;  %v628_v38 = vsel %vm618_vm4, %v625_v43, %v627_v34 }
  0xed   :  { %v244_v27 = vsel %vm1364_vm3, 0, %v1363_v9  ;;  %v630_v17 = vsel %vm620_vm2, %v616_v23, 1326507024  ;;  %v486_v37 = vshrl.u32 %v485_v28, 23  ;;  %vm473_vm6 = vcmp.lt.s32.totalorder %v1936_v57, 2 }
  0xee   :  { %v245_v51 = vsub.s32 32, %v244_v27  ;;  %v249_v10 = vsub.s32 4294967266, %v244_v27  ;;  %v246_v36 = vshll.u32 %v1916_v55, %v244_v27  ;;  %vm175_vm7 = vcmp.lt.s32.totalorder %v1651_v12, 0 }
  0xef   :  { %v624_v45 = vsel %vm618_vm4, %v621_v26, %v623_v49  ;;  %v631_v18 = vsel %vm619_vm1, %v613_v14, %v630_v17  ;;  %vm471_vm8 = vweird.f32 %v1575_v24  ;;  %v1373_v55 = vadd.s32 4294967169, %v486_v37 }
  0xf0   :  { %v247_v40 = vshrl.u32 %v229_v22, %v245_v51  ;;  %v250_v41 = vadd.s32 127, %v249_v10  ;;  %v632_v44 = vsel %vm618_vm4, %v629_v35, %v631_v18  ;;  %vm477_vm9 = vcmp.eq.s32.totalorder %v1936_v57, 2 }
  0xf1   :  { %v1963_v30 = vmul.u32.u64.low %v1942_v25, %v628_v38  ;;  %v1964_v48 = vmul.u32.u64.high %v1942_v25, %v628_v38, %v1963_v30  ;;  %v1968_v61 = vmul.u32.u64.low %v1942_v25, %v632_v44  ;;  %v1969_v16 = vmul.u32.u64.high %v1942_v25, %v632_v44, %v1968_v61 }
  0xf2   :  { %v248_v15 = vor.u32 %v247_v40, %v246_v36  ;;  %v251_v60 = vshll.u32 %v250_v41, 23  ;;  %vm1101_vm10 = vcmp.lt.s32.totalorder %v1938_v21, 2  ;;  %vm1102_vm11 = vcmp.eq.s32.totalorder %v1938_v21, 0 }
  0xf3   :  { %v492_v62 = vadd.s32 1, %v1373_v55  ;;  %vm1105_vm12 = vcmp.eq.s32.totalorder %v1938_v21, 2  ;;  %v259_v5 = vsub.s32 4, %v1909_v42  ;;  %v482_v13 = vand.u32 2147483647, %v1919_v58 }
  0xf4   :  { %v1451_v0 = vpop.eup %1450  ;;  %v252_v4 = vor.u32 4788187, %v251_v60  ;;  %v640_v8 = vmul.u32 %v1942_v25, %v624_v45  ;;  %v643_v59 = vadd.s32 1, %v1964_v48  ;;  %v255_v11 = vcvt.s32.f32 %v248_v15 }
  0xf5   :  { %v1453_v6 = vpop.eup %1452  ;;  %v478_v7 = vxor.u32 2147483648, %v1451_v0  ;;  %vm493_vm13 = vcmp.gt.s32.totalorder %v492_v62, 0  ;;  %vm642_vm14 = vc.u32 %v1969_v16, %v1963_v30  ;;  %v260_v43 = vsel %vm175_vm7, %v259_v5, %v1909_v42 }
  0xf6   :  { %v475_v33 = vxor.u32 2147483648, %v1453_v6  ;;  %v253_v53 = vand.u32 2147483647, %v252_v4  ;;  %v644_v14 = vsel %vm642_vm14, %v643_v59, %v1964_v48  ;;  %v494_v22 = vsel %vm493_vm13, %v492_v62, 0 }
  0xf7   :  { %v479_v2 = vsel %vm477_vm9, %v478_v7, %v1453_v6  ;;  %v1107_v20 = vsel %vm1105_vm12, %v478_v7, %v1453_v6  ;;  %v645_v31 = vadd.s32 %v644_v14, %v640_v8  ;;  %v496_v23 = vand.u32 31, %v494_v22 }
  0xf8   :  { %v476_v28 = vsel %vm474_vm5, %v1451_v0, %v475_v33  ;;  %v1104_v25 = vsel %vm1102_vm11, %v1451_v0, %v475_v33  ;;  %v256_v9 = vmul.f32 %v255_v11, %v253_v53  ;;  %vm174_vm15 = vcmp.le.f32.partialorder %v173_v39, 0.7853982 }
  0xf9   :  { %v480_v29 = vsel %vm473_vm6, %v476_v28, %v479_v2  ;;  %v1108_v32 = vsel %vm1101_vm10, %v1104_v25, %v1107_v20  ;;  %v646_v26 = vadd.s32 536870912, %v645_v31  ;;  %v497_v57 = vsub.s32 32, %v496_v23 }
  0xfa   :  { %v481_v47 = vsel %vm471_vm8, nan, %v480_v29  ;;  %v1109_v3 = vsel %vm471_vm8, nan, %v1108_v32  ;;  %v257_v27 = vxor.u32 2147483648, %v256_v9  ;;  %v262_v49 = vsel %vm174_vm15, 0, %v260_v43 }
  0xfb   :  { %691 = vst [vmem:[#allocation2 + $0x18] sm:$0xff] %v481_v47  ;;  %1321 = vst [vmem:[#allocation4 + $0x18] sm:$0xff] %v1109_v3  ;;  %v2003_v42 = vshrl.u32 %v646_v26, 30  ;;  %v489_v34 = vand.u32 8388607, %v482_v13  ;;  %v499_v51 = vshll.u32 %v1511_v46, %v496_v23  ;;  %v500_v10 = vshrl.u32 %v1512_v50, %v497_v57 }
  0xfc   :  { %v258_v21 = vsel %vm175_vm7, %v257_v27, %v256_v9  ;;  %v503_v35 = vshrl.u32 %v1513_v52, %v497_v57  ;;  %v502_v36 = vshll.u32 %v1512_v50, %v496_v23  ;;  %v506_v38 = vshrl.u32 %v1514_v54, %v497_v57 }
  0xfd   :  { %v261_v24 = vsel %vm174_vm15, %v1651_v12, %v258_v21  ;;  %v648_v39 = vshll.u32 %v2003_v42, 30  ;;  %v505_v17 = vshll.u32 %v1513_v52, %v496_v23  ;;  %v508_v37 = vshll.u32 %v1514_v54, %v496_v23 }
  0xfe   :  { %1454 = vcosq.f32 %v261_v24  ;;  %v509_v40 = vshrl.u32 %v1515_v56, %v497_v57  ;;  %v495_v45 = vshrl.u32 %v494_v22, 5  ;;  %v511_v18 = vshll.u32 %v1515_v56, %v496_v23 }
  0xff   :  { %1456 = vsinq.f32 %v261_v24  ;;  %v2017_v41 = vsub.s32 %v645_v31, %v648_v39  ;;  %v512_v44 = vshrl.u32 %v1516_v63, %v497_v57  ;;  %v501_v48 = vor.u32 %v500_v10, %v499_v51 }
 0x100   :  { %v504_v55 = vor.u32 %v503_v35, %v502_v36  ;;  %v507_v15 = vor.u32 %v506_v38, %v505_v17  ;;  %v510_v50 = vor.u32 %v509_v40, %v508_v37  ;;  %v266_v62 = vand.u32 3, %v262_v49 }
 0x101   :  { %v651_v60 = vsub.s32 0, %v2017_v41  ;;  %v513_v61 = vor.u32 %v512_v44, %v511_v18  ;;  %v891_v52 = vadd.s32 3, %v262_v49  ;;  %v490_v0 = vor.u32 8388608, %v489_v34 }
 0x102   :  { %v498_v4 = vshrl.u32 %v1511_v46, %v497_v57  ;;  %vm514_vm0 = vcmp.lt.s32.totalorder %v495_v45, 1  ;;  %vm517_vm1 = vcmp.lt.s32.totalorder %v495_v45, 4  ;;  %vm516_vm2 = vcmp.lt.s32.totalorder %v495_v45, 3 }
 0x103   :  { %v1378_v54 = vmin.u32 %v651_v60, %v2017_v41  ;;  %v519_v56 = vsel %vm517_vm1, %v507_v15, 2102212464  ;;  %v522_v63 = vsel %vm514_vm0, %v501_v48, %v504_v55  ;;  %v523_v5 = vsel %vm517_vm1, %v510_v50, 920167782 }
 0x104   :  { %v524_v7 = vsel %vm516_vm2, %v507_v15, %v523_v5  ;;  %v526_v8 = vsel %vm514_vm0, %v504_v55, %v507_v15  ;;  %v527_v59 = vsel %vm517_vm1, %v513_v61, 1326507024  ;;  %vm267_vm3 = vcmp.lt.s32.totalorder %v266_v62, 2 }
 0x105   :  { %v653_v6 = vclz %v1378_v54  ;;  %vm268_vm4 = vcmp.eq.s32.totalorder %v266_v62, 0  ;;  %v892_v33 = vand.u32 3, %v891_v52  ;;  %vm515_vm5 = vcmp.lt.s32.totalorder %v495_v45, 2 }
 0x106   :  { %v530_v53 = vshll.u32 %v490_v0, 8  ;;  %vm265_vm6 = vweird.f32 %v1651_v12  ;;  %v518_v11 = vsel %vm514_vm0, %v498_v4, %v501_v48  ;;  %v525_v2 = vsel %vm515_vm5, %v522_v63, %v524_v7 }
 0x107   :  { %v1379_v46 = vadd.s32 4294967294, %v653_v6  ;;  %v528_v20 = vsel %vm516_vm2, %v510_v50, %v527_v59  ;;  %v520_v14 = vsel %vm516_vm2, %v504_v55, %v519_v56  ;;  %vm271_vm7 = vcmp.eq.s32.totalorder %v266_v62, 2 }
 0x108   :  { %v529_v22 = vsel %vm515_vm5, %v526_v8, %v528_v20  ;;  %v2033_v28 = vmul.u32.u64.low %v530_v53, %v525_v2  ;;  %v2034_v25 = vmul.u32.u64.high %v530_v53, %v525_v2, %v2033_v28  ;;  %vm893_vm9 = vcmp.lt.s32.totalorder %v892_v33, 2 }
 0x109   :  { %vm1380_vm8 = vcmp.lt.s32.totalorder %v1379_v46, 0  ;;  %v2037_v9 = vmul.u32.u64.low %v530_v53, %v529_v22  ;;  %v2038_v31 = vmul.u32.u64.high %v530_v53, %v529_v22, %v2037_v9  ;;  %vm894_vm10 = vcmp.eq.s32.totalorder %v892_v33, 0 }
 0x10a   :  { %v641_v32 = vadd.s32 %v1963_v30, %v1969_v16  ;;  %v656_v43 = vsel %vm1380_vm8, 0, %v1379_v46  ;;  %v521_v26 = vsel %vm515_vm5, %v518_v11, %v520_v14  ;;  %vm897_vm11 = vcmp.eq.s32.totalorder %v892_v33, 2 }
 0x10b   :  { %v1455_v29 = vpop.eup %1454  ;;  %v657_v3 = vsub.s32 32, %v656_v43  ;;  %v661_v27 = vsub.s32 4294967266, %v656_v43  ;;  %v658_v21 = vshll.u32 %v2017_v41, %v656_v43  ;;  %v540_v49 = vadd.s32 1, %v2034_v25 }
 0x10c   :  { %v1457_v23 = vpop.eup %1456  ;;  %v272_v47 = vxor.u32 2147483648, %v1455_v29  ;;  %v537_v35 = vmul.u32 %v530_v53, %v521_v26  ;;  %vm539_vm12 = vc.u32 %v2038_v31, %v2033_v28  ;;  %vm587_vm13 = vcmp.lt.s32.totalorder %v1758_v19, 0 }
 0x10d   :  { %v269_v57 = vxor.u32 2147483648, %v1457_v23  ;;  %v659_v51 = vshrl.u32 %v641_v32, %v657_v3  ;;  %v662_v10 = vadd.s32 127, %v661_v27  ;;  %v541_v41 = vsel %vm539_vm12, %v540_v49, %v2034_v25 }
 0x10e   :  { %v273_v34 = vsel %vm271_vm7, %v272_v47, %v1457_v23  ;;  %v899_v24 = vsel %vm897_vm11, %v272_v47, %v1457_v23  ;;  %v542_v18 = vadd.s32 %v541_v41, %v537_v35  ;;  %v671_v12 = vsub.s32 4, %v2003_v42 }
 0x10f   :  { %v270_v30 = vsel %vm268_vm4, %v1455_v29, %v269_v57  ;;  %v896_v16 = vsel %vm894_vm10, %v1455_v29, %v269_v57  ;;  %v660_v38 = vor.u32 %v659_v51, %v658_v21  ;;  %v663_v17 = vshll.u32 %v662_v10, 23 }
 0x110   :  { %v274_v39 = vsel %vm267_vm3, %v270_v30, %v273_v34  ;;  %v900_v36 = vsel %vm893_vm9, %v896_v16, %v899_v24  ;;  %v543_v55 = vadd.s32 536870912, %v542_v18  ;;  %vm586_vm14 = vcmp.le.f32.partialorder %v585_v1, 0.7853982 }
 0x111   :  { %v275_v37 = vsel %vm265_vm6, nan, %v274_v39  ;;  %v901_v40 = vsel %vm265_vm6, nan, %v900_v36  ;;  %v664_v45 = vor.u32 4788187, %v663_v17  ;;  %v667_v48 = vcvt.s32.f32 %v660_v38 }
 0x112   :  { %689 = vst [vmem:[#allocation2 + $0x8] sm:$0xff] %v275_v37  ;;  %1319 = vst [vmem:[#allocation4 + $0x8] sm:$0xff] %v901_v40  ;;  %v2057_v50 = vshrl.u32 %v543_v55, 30  ;;  %v672_v4 = vsel %vm587_vm13, %v671_v12, %v2003_v42  ;;  %v538_v59 = vadd.s32 %v2033_v28, %v2038_v31  ;;  %vm677_vm0 = vweird.f32 %v1758_v19 }
 0x113   :  { %v665_v44 = vand.u32 2147483647, %v664_v45  ;;  %v674_v63 = vsel %vm586_vm14, 0, %v672_v4  ;;  %vm484_vm7 = vcmp.lt.s32.totalorder %v1919_v58, 0  ;;  %vm483_vm8 = vcmp.le.f32.partialorder %v482_v13, 0.7853982 }
 0x114   :  { %v545_v61 = vshll.u32 %v2057_v50, 30  ;;  %v1307_v7 = vadd.s32 3, %v674_v63  ;;  %v678_v53 = vand.u32 3, %v674_v63  ;;  %v568_v24 = vsub.s32 4, %v2057_v50 }
 0x115   :  { %v668_v15 = vmul.f32 %v667_v48, %v665_v44 }
 0x116   :  { %v546_v52 = vsub.s32 %v542_v18, %v545_v61  ;;  %v1308_v46 = vand.u32 3, %v1307_v7  ;;  %vm680_vm1 = vcmp.eq.s32.totalorder %v678_v53, 0  ;;  %vm683_vm2 = vcmp.eq.s32.totalorder %v678_v53, 2 }
 0x117   :  { %v669_v60 = vxor.u32 2147483648, %v668_v15  ;;  %vm679_vm5 = vcmp.lt.s32.totalorder %v678_v53, 2  ;;  %v569_v30 = vsel %vm484_vm7, %v568_v24, %v2057_v50 }
 0x118   :  { %v548_v54 = vsub.s32 0, %v546_v52  ;;  %vm1313_vm3 = vcmp.eq.s32.totalorder %v1308_v46, 2  ;;  %vm1310_vm4 = vcmp.eq.s32.totalorder %v1308_v46, 0  ;;  %vm1309_vm6 = vcmp.lt.s32.totalorder %v1308_v46, 2 }
 0x119   :  { %v670_v62 = vsel %vm587_vm13, %v669_v60, %v668_v15 }
 0x11a   :  { %v673_v0 = vsel %vm586_vm14, %v1758_v19, %v670_v62  ;;  %v1374_v56 = vmin.u32 %v548_v54, %v546_v52  ;;  %v571_v19 = vsel %vm483_vm8, 0, %v569_v30 }
 0x11b   :  { %1458 = vcosq.f32 %v673_v0  ;;  %v1203_v16 = vadd.s32 3, %v571_v19  ;;  %v575_v35 = vand.u32 3, %v571_v19 }
 0x11c   :  { %1460 = vsinq.f32 %v673_v0  ;;  %v550_v5 = vclz %v1374_v56 }
 0x11d   :  { %v1204_v39 = vand.u32 3, %v1203_v16  ;;  %vm580_vm9 = vcmp.eq.s32.totalorder %v575_v35, 2  ;;  %vm577_vm11 = vcmp.eq.s32.totalorder %v575_v35, 0  ;;  %vm576_vm13 = vcmp.lt.s32.totalorder %v575_v35, 2 }
 0x11e   :  { %v1375_v6 = vadd.s32 4294967294, %v550_v5 }
 0x11f   :  { %vm1209_vm10 = vcmp.eq.s32.totalorder %v1204_v39, 2  ;;  %vm1206_vm12 = vcmp.eq.s32.totalorder %v1204_v39, 0  ;;  %vm1205_vm14 = vcmp.lt.s32.totalorder %v1204_v39, 2 }
 0x120   :  { %vm1376_vm15 = vcmp.lt.s32.totalorder %v1375_v6, 0 }
 0x121   :  { %v553_v8 = vsel %vm1376_vm15, 0, %v1375_v6  ;;  %vm574_vm15 = vweird.f32 %v1919_v58 }
 0x122   :  { %v554_v1 = vsub.s32 32, %v553_v8  ;;  %v558_v33 = vsub.s32 4294967266, %v553_v8  ;;  %v555_v11 = vshll.u32 %v546_v52, %v553_v8 }
 0x124   :  { %v556_v2 = vshrl.u32 %v538_v59, %v554_v1  ;;  %v559_v20 = vadd.s32 127, %v558_v33 }
 0x126   :  { %v557_v25 = vor.u32 %v556_v2, %v555_v11  ;;  %v560_v9 = vshll.u32 %v559_v20, 23 }
 0x128   :  { %v1459_v14 = vpop.eup %1458  ;;  %v561_v31 = vor.u32 4788187, %v560_v9  ;;  %v564_v26 = vcvt.s32.f32 %v557_v25 }
 0x129   :  { %v1461_v42 = vpop.eup %1460  ;;  %v684_v22 = vxor.u32 2147483648, %v1459_v14 }
 0x12a   :  { %v681_v29 = vxor.u32 2147483648, %v1461_v42  ;;  %v562_v27 = vand.u32 2147483647, %v561_v31 }
 0x12b   :  { %v685_v32 = vsel %vm683_vm2, %v684_v22, %v1461_v42  ;;  %v1315_v28 = vsel %vm1313_vm3, %v684_v22, %v1461_v42 }
 0x12c   :  { %v682_v43 = vsel %vm680_vm1, %v1459_v14, %v681_v29  ;;  %v1312_v23 = vsel %vm1310_vm4, %v1459_v14, %v681_v29  ;;  %v565_v49 = vmul.f32 %v564_v26, %v562_v27 }
 0x12d   :  { %v686_v47 = vsel %vm679_vm5, %v682_v43, %v685_v32  ;;  %v1316_v3 = vsel %vm1309_vm6, %v1312_v23, %v1315_v28 }
 0x12e   :  { %v687_v57 = vsel %vm677_vm0, nan, %v686_v47  ;;  %v1317_v21 = vsel %vm677_vm0, nan, %v1316_v3  ;;  %v566_v34 = vxor.u32 2147483648, %v565_v49 }
 0x12f   :  { %693 = vst [vmem:[#allocation2 + $0x28] sm:$0xff] %v687_v57  ;;  %1323 = vst [vmem:[#allocation4 + $0x28] sm:$0xff] %v1317_v21 }
 0x130   :  { %v567_v51 = vsel %vm484_vm7, %v566_v34, %v565_v49 }
 0x131   :  { %v570_v10 = vsel %vm483_vm8, %v1919_v58, %v567_v51 }
 0x132   :  { %1462 = vcosq.f32 %v570_v10 }
 0x133   :  { %1464 = vsinq.f32 %v570_v10 }
 0x13f   :  { %v1463_v36 = vpop.eup %1462 }
 0x140   :  { %v1465_v38 = vpop.eup %1464  ;;  %v581_v17 = vxor.u32 2147483648, %v1463_v36 }
 0x141   :  { %v578_v37 = vxor.u32 2147483648, %v1465_v38 }
 0x142   :  { %v582_v13 = vsel %vm580_vm9, %v581_v17, %v1465_v38  ;;  %v1211_v40 = vsel %vm1209_vm10, %v581_v17, %v1465_v38 }
 0x143   :  { %v579_v41 = vsel %vm577_vm11, %v1463_v36, %v578_v37  ;;  %v1208_v45 = vsel %vm1206_vm12, %v1463_v36, %v578_v37 }
 0x144   :  { %v583_v18 = vsel %vm576_vm13, %v579_v41, %v582_v13  ;;  %v1212_v44 = vsel %vm1205_vm14, %v1208_v45, %v1211_v40 }
 0x145   :  { %v584_v48 = vsel %vm574_vm15, nan, %v583_v18  ;;  %v1213_v55 = vsel %vm574_vm15, nan, %v1212_v44 }
 0x146   :  { %692 = vst [vmem:[#allocation2 + $0x20] sm:$0xff] %v584_v48  ;;  %1322 = vst [vmem:[#allocation4 + $0x20] sm:$0xff] %v1213_v55 }
 0x147   :  { %1477 = shalt.err (!%p1474_p4)
}
 0x148   :  { %s1519_s29 = smov 128   ;;  %s1520_s30 = smov 8  }
 0x149   :  { %1335 = dma.vmem_to_hbm [thread:$0]  %s1330_s1, 768, %s2088_s2, [#allocation3], %s1519_s29, %s1519_s29, %s1520_s30  }
 0x14a   :  { %s1486_s6 = scalar_lea.vmem %s1342_s27, 768  ;;  %p1491_p6 = scmp.lt.s32.totalorder %s1342_s27, %s1342_s27 }
 0x14b   :  { %p1487_p5 = scmp.ne.s32.totalorder %s1342_s27, %s1486_s6  ;;  %p1492_p7 = scmp.lt.s32.totalorder %s1486_s6, %s1486_s6 }
 0x14d   :  { %p1493_p8 = por %p1492_p7, %p1491_p6 }
 0x14f   :  { %p1494_p9 = pnand %p1493_p8, %p1487_p5 }
 0x151   :  { %1497 = shalt.err (!%p1494_p9)
}
 0x152   :  { %1347 = dma.vmem_to_hbm [thread:$0]  %s1342_s27, 768, %s2089_s3, [#allocation5], %s1519_s29, %s1519_s29, %s1520_s30  }
 0x153   :  { %1506 = dma.done.wait [#allocation3], 768  }
 0x154   :  { %1507 = vsyncadd [#allocation3], 4294966528 }
 0x155   :  { %1508 = dma.done.wait [#allocation5], 768  }
 0x156   :  { %1509 = vsyncadd [#allocation5], 4294966528 }
 0x157   :  { %1354 = vsyncpa [#allocation3], 1 }
 0x158   :  { %1355 = vsyncpa [#allocation5], 1 }

</bundles_post_ra>
